<compile_context>
chip_gen: v5e
topology: v5e:2x2
jax: 0.10.0
libtpu: 0.0.40
codegen_flags: <defaults>
</compile_context>

<pallas_src>
import jax
import jax.numpy as jnp
from jax.experimental import pallas as pl
from jax.experimental.pallas import tpu as pltpu


def _make_pairs_conv_kernel(num_layers, c_x, extra_c, pair_rows, seq,
                            compute_dtype):
    """Fused [pair-matrix build -> (1x1 conv + ReLU) * num_layers] kernel.

    Works on one batch element: output tile is (C_out, pair_rows*seq) with the
    pixel axis on lanes (lane-dense stores).
    """

    def roll_right(x2d, shift):
        # torch: gather(x, -1, arange(seq).roll(shift)) == x[..., (j - shift) % seq]
        s = shift % seq
        if s == 0:
            return x2d
        return jnp.concatenate([x2d[:, seq - s:], x2d[:, :seq - s]], axis=1)

    def body(x_ref, xcat_ref, w_ref, b_ref, o_ref):
        xb = x_ref[0].astype(compute_dtype)                       # (c_x, seq)

        # pair_matrix channels [0:c_x): x repeated along the pair-row axis.
        x_rep = jnp.concatenate([xb] * pair_rows, axis=1)          # (c_x, H*W)
        # pair_matrix channels [c_x:2*c_x): row d is x rolled right by d+1.
        rolled = jnp.concatenate(
            [roll_right(xb, d + 1) for d in range(pair_rows)], axis=1)

        # First layer: split the channel-contraction over the three groups of
        # pairs_cat = concat(x_concat, x_rep, rolled) so the concatenated pair
        # matrix is never materialized.
        w0 = w_ref[0].astype(compute_dtype)                        # (C_out, C_in)
        h = jnp.dot(w0[:, extra_c:extra_c + c_x], x_rep,
                    preferred_element_type=jnp.float32)
        h = h + jnp.dot(w0[:, extra_c + c_x:extra_c + 2 * c_x], rolled,
                        preferred_element_type=jnp.float32)
        if xcat_ref is not None:
            h = h + jnp.dot(w0[:, :extra_c],
                            xcat_ref[0].astype(compute_dtype),
                            preferred_element_type=jnp.float32)
        h = jnp.maximum(h + b_ref[0], 0.0)                         # (C_out, H*W)

        # Remaining layers: plain channel matmul + bias + ReLU, f32 accumulate.
        for l in range(1, num_layers):
            w = w_ref[l].astype(compute_dtype)
            h = jnp.dot(w, h.astype(compute_dtype),
                        preferred_element_type=jnp.float32)
            h = jnp.maximum(h + b_ref[l], 0.0)

        o_ref[0] = h.astype(o_ref.dtype)

    if extra_c > 0:
        def kernel(x_ref, xcat_ref, w_ref, b_ref, o_ref):
            body(x_ref, xcat_ref, w_ref, b_ref, o_ref)
    else:
        def kernel(x_ref, w_ref, b_ref, o_ref):
            body(x_ref, None, w_ref, b_ref, o_ref)
    return kernel


def pairs_of_pairs_forward(x, x_concat, weights, biases, batch_size, size,
                           compute_dtype=jnp.float32):
    """x: (B, C_x, size); x_concat: tuple of (B, *, size-1, size);
    weights[l]: (C_out, C_in) (PyTorch 1x1-conv weight, squeezed);
    biases[l]: (C_out,).  Returns NCHW (B, C_out, size-1, size)."""
    B, c_x, seq = x.shape
    assert B == batch_size and seq == size
    pair_rows = size - 1
    hw = pair_rows * size

    num_layers = len(weights)
    c_out, c_in = weights[0].shape
    for w in weights:
        # conv_block_2D(output_channels, output_channels, layers): all layers
        # have identical (C, C) weights, so they can be stacked.
        assert w.shape == (c_out, c_in) and c_in == c_out
    extra_c = c_in - 2 * c_x
    assert extra_c >= 0, "concat channels must sum to the conv input channels"

    w_stack = jnp.stack(weights, axis=0)                                   # (L, C, C)
    b_stack = jnp.stack(biases, axis=0)[:, :, None].astype(jnp.float32)    # (L, C, 1)

    args = [x]
    in_specs = [pl.BlockSpec((1, c_x, size), lambda b: (b, 0, 0))]
    if extra_c > 0:
        # Flatten H,W (free: contiguous) and merge the x_concat pieces once.
        xcat = jnp.concatenate(
            [xc.reshape(B, xc.shape[1], hw) for xc in x_concat], axis=1)
        assert xcat.shape == (B, extra_c, hw)
        args.append(xcat)
        in_specs.append(pl.BlockSpec((1, extra_c, hw), lambda b: (b, 0, 0)))
    args += [w_stack, b_stack]
    in_specs += [
        pl.BlockSpec((num_layers, c_out, c_in), lambda b: (0, 0, 0)),
        pl.BlockSpec((num_layers, c_out, 1), lambda b: (0, 0, 0)),
    ]

    # Advisory cost estimate + VMEM limit matched to the tiles (clamped so it
    # stays comfortably under v7x's 64 MiB physical VMEM).
    flops = 2 * B * hw * c_in * c_out * num_layers
    bytes_accessed = 4 * (x.size + B * extra_c * hw + B * c_out * hw
                          + w_stack.size + b_stack.size)
    per_step = 4 * (c_x * size + extra_c * hw + 2 * c_out * hw)
    resident = 4 * (w_stack.size + b_stack.size)
    vmem_limit = int(min(max(16 * (per_step + resident), 16 * 1024 * 1024),
                         48 * 1024 * 1024))

    out = pl.pallas_call(
        _make_pairs_conv_kernel(num_layers, c_x, extra_c, pair_rows, size,
                                compute_dtype),
        grid=(B,),
        in_specs=in_specs,
        out_specs=pl.BlockSpec((1, c_out, hw), lambda b: (b, 0, 0)),
        out_shape=jax.ShapeDtypeStruct((B, c_out, hw), x.dtype),
        compiler_params=pltpu.CompilerParams(
            dimension_semantics=("parallel",),
            vmem_limit_bytes=vmem_limit),
        cost_estimate=pl.CostEstimate(flops=flops, transcendentals=0,
                                      bytes_accessed=bytes_accessed),
    )(*args)
    # TODO(synk): for very large `size` (HW*C_out per batch approaching VMEM),
    # additionally tile the pair-row axis inside the grid.
    return out.reshape(B, c_out, pair_rows, size)


def pairs_of_pairs_reference(x, x_concat, weights, biases, batch_size, size):
    """Pure-JAX reference that mirrors the PyTorch module directly
    (explicit rolled-arange gather, NOT the kernel's roll construction)."""
    B, c_x, _ = x.shape
    H = size - 1
    x_rep = jnp.broadcast_to(x[:, :, None, :], (B, c_x, H, size))
    # torch: roll[:, :, d, :] = arange(size).roll(d+1)  ->  idx[d, j] = (j-d-1) % size
    d_idx = jnp.arange(H)[:, None]
    j_idx = jnp.arange(size)[None, :]
    roll_idx = (j_idx - (d_idx + 1)) % size
    roll_idx = jnp.broadcast_to(roll_idx[None, None], (B, c_x, H, size))
    gathered = jnp.take_along_axis(x_rep, roll_idx, axis=3)
    pair_matrix = jnp.concatenate([x_rep, gathered], axis=1)
    h = jnp.concatenate(list(x_concat) + [pair_matrix], axis=1)
    for w, b in zip(weights, biases):
        h = jnp.einsum("oi,bihw->bohw", w, h) + b[None, :, None, None]
        h = jnp.maximum(h, 0.0)
    return h


if __name__ == "__main__":
    key = jax.random.PRNGKey(0)

    # Small shapes consistent with the module.
    B = 2                 # batch_size
    C_x = 4               # channels of x
    size = 8              # sequence length -> spatial dims (size-1, size)
    layers = 2
    output_channels = 16  # conv in/out channels; = 2*C_x + extra concat channels

    k1, k2, k3, k4 = jax.random.split(key, 4)
    x = jax.random.normal(k1, (B, C_x, size), dtype=jnp.float32)
    extra_c = output_channels - 2 * C_x
    x_concat = (
        jax.random.normal(k2, (B, extra_c, size - 1, size), dtype=jnp.float32),
    )

    # Synthetic conv_block_2D params in PyTorch layout: weight (C_out, C_in), bias (C_out,)
    wkeys = jax.random.split(k3, layers)
    bkeys = jax.random.split(k4, layers)
    weights = [
        0.1 * jax.random.normal(wkeys[l], (output_channels, output_channels),
                                jnp.float32)
        for l in range(layers)
    ]
    biases = [
        0.1 * jax.random.normal(bkeys[l], (output_channels,), jnp.float32)
        for l in range(layers)
    ]

    out = pairs_of_pairs_forward(x, x_concat, weights, biases, B, size)
    out = jax.block_until_ready(out)

    ref = pairs_of_pairs_reference(x, x_concat, weights, biases, B, size)
    assert out.shape == (B, output_channels, size - 1, size), out.shape
    assert jnp.allclose(out, ref, atol=1e-4, rtol=1e-4), "mismatch vs reference"

    print("KERNEL_OK")
</pallas_src>

<mosaic_0001>
module attributes {stable_mosaic.version = 11 : i64} {
  func.func @kernel(%arg0: i32, %arg1: memref<1x4x8xf32, #tpu.memory_space<vmem>>, %arg2: memref<1x8x56xf32, #tpu.memory_space<vmem>>, %arg3: memref<2x16x16xf32, #tpu.memory_space<vmem>>, %arg4: memref<2x16x1xf32, #tpu.memory_space<vmem>>, %arg5: memref<1x16x56xf32, #tpu.memory_space<vmem>>) attributes {dimension_semantics = [#tpu.dimension_semantics<parallel>], iteration_bounds = array<i64: 2>, scalar_prefetch = 0 : i64, scratch_operands = 0 : i64, tpu.core_type = #tpu.core_type<tc>, window_params = [{transform_indices = @transform_0, window_bounds = array<i64: 1, 4, 8>}, {transform_indices = @transform_1, window_bounds = array<i64: 1, 8, 56>}, {pipeline_mode = #tpu.pipeline_mode<synchronous>, transform_indices = @transform_2, window_bounds = array<i64: 2, 16, 16>}, {pipeline_mode = #tpu.pipeline_mode<synchronous>, transform_indices = @transform_3, window_bounds = array<i64: 2, 16, 1>}, {transform_indices = @transform_4, window_bounds = array<i64: 1, 16, 56>}]} {
    %c0 = arith.constant 0 : index
    %c0_0 = arith.constant 0 : index
    %c0_1 = arith.constant 0 : index
    %0 = vector.load %arg1[%c0, %c0_0, %c0_1] : memref<1x4x8xf32, #tpu.memory_space<vmem>>, vector<1x4x8xf32>
    %1 = vector.shape_cast %0 : vector<1x4x8xf32> to vector<4x8xf32>
    %2 = tpu.concatenate %1, %1, %1, %1, %1, %1, %1 in 1 : vector<4x8xf32>, vector<4x8xf32>, vector<4x8xf32>, vector<4x8xf32>, vector<4x8xf32>, vector<4x8xf32>, vector<4x8xf32> -> vector<4x56xf32>
    %3 = vector.extract_strided_slice %1 {offsets = [0, 7], sizes = [4, 1], strides = [1, 1]} : vector<4x8xf32> to vector<4x1xf32>
    %4 = vector.extract_strided_slice %1 {offsets = [0, 0], sizes = [4, 7], strides = [1, 1]} : vector<4x8xf32> to vector<4x7xf32>
    %5 = tpu.concatenate %3, %4 in 1 : vector<4x1xf32>, vector<4x7xf32> -> vector<4x8xf32>
    %6 = vector.extract_strided_slice %1 {offsets = [0, 6], sizes = [4, 2], strides = [1, 1]} : vector<4x8xf32> to vector<4x2xf32>
    %7 = vector.extract_strided_slice %1 {offsets = [0, 0], sizes = [4, 6], strides = [1, 1]} : vector<4x8xf32> to vector<4x6xf32>
    %8 = tpu.concatenate %6, %7 in 1 : vector<4x2xf32>, vector<4x6xf32> -> vector<4x8xf32>
    %9 = vector.extract_strided_slice %1 {offsets = [0, 5], sizes = [4, 3], strides = [1, 1]} : vector<4x8xf32> to vector<4x3xf32>
    %10 = vector.extract_strided_slice %1 {offsets = [0, 0], sizes = [4, 5], strides = [1, 1]} : vector<4x8xf32> to vector<4x5xf32>
    %11 = tpu.concatenate %9, %10 in 1 : vector<4x3xf32>, vector<4x5xf32> -> vector<4x8xf32>
    %12 = vector.extract_strided_slice %1 {offsets = [0, 4], sizes = [4, 4], strides = [1, 1]} : vector<4x8xf32> to vector<4x4xf32>
    %13 = vector.extract_strided_slice %1 {offsets = [0, 0], sizes = [4, 4], strides = [1, 1]} : vector<4x8xf32> to vector<4x4xf32>
    %14 = tpu.concatenate %12, %13 in 1 : vector<4x4xf32>, vector<4x4xf32> -> vector<4x8xf32>
    %15 = vector.extract_strided_slice %1 {offsets = [0, 3], sizes = [4, 5], strides = [1, 1]} : vector<4x8xf32> to vector<4x5xf32>
    %16 = vector.extract_strided_slice %1 {offsets = [0, 0], sizes = [4, 3], strides = [1, 1]} : vector<4x8xf32> to vector<4x3xf32>
    %17 = tpu.concatenate %15, %16 in 1 : vector<4x5xf32>, vector<4x3xf32> -> vector<4x8xf32>
    %18 = vector.extract_strided_slice %1 {offsets = [0, 2], sizes = [4, 6], strides = [1, 1]} : vector<4x8xf32> to vector<4x6xf32>
    %19 = vector.extract_strided_slice %1 {offsets = [0, 0], sizes = [4, 2], strides = [1, 1]} : vector<4x8xf32> to vector<4x2xf32>
    %20 = tpu.concatenate %18, %19 in 1 : vector<4x6xf32>, vector<4x2xf32> -> vector<4x8xf32>
    %21 = vector.extract_strided_slice %1 {offsets = [0, 1], sizes = [4, 7], strides = [1, 1]} : vector<4x8xf32> to vector<4x7xf32>
    %22 = vector.extract_strided_slice %1 {offsets = [0, 0], sizes = [4, 1], strides = [1, 1]} : vector<4x8xf32> to vector<4x1xf32>
    %23 = tpu.concatenate %21, %22 in 1 : vector<4x7xf32>, vector<4x1xf32> -> vector<4x8xf32>
    %24 = tpu.concatenate %5, %8, %11, %14, %17, %20, %23 in 1 : vector<4x8xf32>, vector<4x8xf32>, vector<4x8xf32>, vector<4x8xf32>, vector<4x8xf32>, vector<4x8xf32>, vector<4x8xf32> -> vector<4x56xf32>
    %c0_2 = arith.constant 0 : index
    %c0_3 = arith.constant 0 : index
    %c0_4 = arith.constant 0 : index
    %25 = vector.load %arg3[%c0_2, %c0_3, %c0_4] : memref<2x16x16xf32, #tpu.memory_space<vmem>>, vector<1x16x16xf32>
    %26 = vector.shape_cast %25 : vector<1x16x16xf32> to vector<16x16xf32>
    %27 = vector.extract_strided_slice %26 {offsets = [0, 8], sizes = [16, 4], strides = [1, 1]} : vector<16x16xf32> to vector<16x4xf32>
    %cst = arith.constant dense<0.000000e+00> : vector<16x56xf32>
    %28 = tpu.matmul %27, %2, %cst {dimension_numbers = #tpu.dot_dimension_numbers<[1], [0], [0], [1], [0, 0, 1, 1], [], []>} : vector<16x4xf32>, vector<4x56xf32>, vector<16x56xf32> -> vector<16x56xf32>
    %29 = vector.extract_strided_slice %26 {offsets = [0, 12], sizes = [16, 4], strides = [1, 1]} : vector<16x16xf32> to vector<16x4xf32>
    %cst_5 = arith.constant dense<0.000000e+00> : vector<16x56xf32>
    %30 = tpu.matmul %29, %24, %cst_5 {dimension_numbers = #tpu.dot_dimension_numbers<[1], [0], [0], [1], [0, 0, 1, 1], [], []>} : vector<16x4xf32>, vector<4x56xf32>, vector<16x56xf32> -> vector<16x56xf32>
    %31 = arith.addf %28, %30 : vector<16x56xf32>
    %32 = vector.extract_strided_slice %26 {offsets = [0, 0], sizes = [16, 8], strides = [1, 1]} : vector<16x16xf32> to vector<16x8xf32>
    %c0_6 = arith.constant 0 : index
    %c0_7 = arith.constant 0 : index
    %c0_8 = arith.constant 0 : index
    %33 = vector.load %arg2[%c0_6, %c0_7, %c0_8] : memref<1x8x56xf32, #tpu.memory_space<vmem>>, vector<1x8x56xf32>
    %34 = vector.shape_cast %33 : vector<1x8x56xf32> to vector<8x56xf32>
    %cst_9 = arith.constant dense<0.000000e+00> : vector<16x56xf32>
    %35 = tpu.matmul %32, %34, %cst_9 {dimension_numbers = #tpu.dot_dimension_numbers<[1], [0], [0], [1], [0, 0, 1, 1], [], []>} : vector<16x8xf32>, vector<8x56xf32>, vector<16x56xf32> -> vector<16x56xf32>
    %36 = arith.addf %31, %35 : vector<16x56xf32>
    %c0_10 = arith.constant 0 : index
    %c0_11 = arith.constant 0 : index
    %c0_12 = arith.constant 0 : index
    %37 = vector.load %arg4[%c0_10, %c0_11, %c0_12] : memref<2x16x1xf32, #tpu.memory_space<vmem>>, vector<1x16x1xf32>
    %38 = vector.shape_cast %37 : vector<1x16x1xf32> to vector<16x1xf32>
    %39 = vector.broadcast %38 : vector<16x1xf32> to vector<16x56xf32>
    %40 = arith.addf %36, %39 : vector<16x56xf32>
    %cst_13 = arith.constant 0.000000e+00 : f32
    %41 = vector.broadcast %cst_13 : f32 to vector<16x56xf32>
    %42 = arith.maximumf %40, %41 : vector<16x56xf32>
    %c1 = arith.constant 1 : index
    %c0_14 = arith.constant 0 : index
    %c0_15 = arith.constant 0 : index
    %43 = vector.load %arg3[%c1, %c0_14, %c0_15] : memref<2x16x16xf32, #tpu.memory_space<vmem>>, vector<1x16x16xf32>
    %44 = vector.shape_cast %43 : vector<1x16x16xf32> to vector<16x16xf32>
    %cst_16 = arith.constant dense<0.000000e+00> : vector<16x56xf32>
    %45 = tpu.matmul %44, %42, %cst_16 {dimension_numbers = #tpu.dot_dimension_numbers<[1], [0], [0], [1], [0, 0, 1, 1], [], []>} : vector<16x16xf32>, vector<16x56xf32>, vector<16x56xf32> -> vector<16x56xf32>
    %c1_17 = arith.constant 1 : index
    %c0_18 = arith.constant 0 : index
    %c0_19 = arith.constant 0 : index
    %46 = vector.load %arg4[%c1_17, %c0_18, %c0_19] : memref<2x16x1xf32, #tpu.memory_space<vmem>>, vector<1x16x1xf32>
    %47 = vector.shape_cast %46 : vector<1x16x1xf32> to vector<16x1xf32>
    %48 = vector.broadcast %47 : vector<16x1xf32> to vector<16x56xf32>
    %49 = arith.addf %45, %48 : vector<16x56xf32>
    %cst_20 = arith.constant 0.000000e+00 : f32
    %50 = vector.broadcast %cst_20 : f32 to vector<16x56xf32>
    %51 = arith.maximumf %49, %50 : vector<16x56xf32>
    %c0_21 = arith.constant 0 : index
    %c0_22 = arith.constant 0 : index
    %c0_23 = arith.constant 0 : index
    %52 = vector.load %arg5[%c0_21, %c0_22, %c0_23] : memref<1x16x56xf32, #tpu.memory_space<vmem>>, vector<1x16x56xf32>
    %53 = vector.shape_cast %52 : vector<1x16x56xf32> to vector<16x56xf32>
    %54 = vector.shape_cast %51 : vector<16x56xf32> to vector<1x16x56xf32>
    tpu.vector_store %arg5[%c0_21, %c0_22, %c0_23], %54 {strides = array<i32>} : memref<1x16x56xf32, #tpu.memory_space<vmem>>, vector<1x16x56xf32>,
    return
  }
  func.func @transform_0(%arg0: i32) -> (i32, i32, i32) {
    %c0_i32 = arith.constant 0 : i32
    %c0_i32_0 = arith.constant 0 : i32
    %c0_i32_1 = arith.constant 0 : i32
    return %arg0, %c0_i32, %c0_i32_0 : i32, i32, i32
  }
  func.func @transform_1(%arg0: i32) -> (i32, i32, i32) {
    %c0_i32 = arith.constant 0 : i32
    %c0_i32_0 = arith.constant 0 : i32
    %c0_i32_1 = arith.constant 0 : i32
    return %arg0, %c0_i32, %c0_i32_0 : i32, i32, i32
  }
  func.func @transform_2(%arg0: i32) -> (i32, i32, i32) {
    %c0_i32 = arith.constant 0 : i32
    %c0_i32_0 = arith.constant 0 : i32
    %c0_i32_1 = arith.constant 0 : i32
    %c0_i32_2 = arith.constant 0 : i32
    return %c0_i32, %c0_i32_0, %c0_i32_1 : i32, i32, i32
  }
  func.func @transform_3(%arg0: i32) -> (i32, i32, i32) {
    %c0_i32 = arith.constant 0 : i32
    %c0_i32_0 = arith.constant 0 : i32
    %c0_i32_1 = arith.constant 0 : i32
    %c0_i32_2 = arith.constant 0 : i32
    return %c0_i32, %c0_i32_0, %c0_i32_1 : i32, i32, i32
  }
  func.func @transform_4(%arg0: i32) -> (i32, i32, i32) {
    %c0_i32 = arith.constant 0 : i32
    %c0_i32_0 = arith.constant 0 : i32
    %c0_i32_1 = arith.constant 0 : i32
    return %arg0, %c0_i32, %c0_i32_0 : i32, i32, i32
  }
}

</mosaic_0001>

<bundles_post_ra>
// kernel: tpu_custom_call.1
= control target key start
LH: loop header
LB: loop body
LE: loop exit
PB: predicated region body
PF: predicated region fallthrough
CT: control target
= control target key end

     0   :  { %s1187_s0 = inlined_call_operand.hbm [shape: f32[2,4,8], index: 0, kind: input, shape index: {}]   ;;  %s1188_s1 = inlined_call_operand.hbm [shape: f32[2,8,56], index: 1, kind: input, shape index: {}]   ;;  %s1189_s2 = inlined_call_operand.vmem [shape: f32[2,16,16], index: 2, kind: input, shape index: {}]   ;;  %s1190_s3 = inlined_call_operand.vmem [shape: f32[2,16,1], index: 3, kind: input, shape index: {}]   ;;  %s1191_s4 = inlined_call_operand.hbm [shape: f32[2,16,56], index: 4, kind: output, shape index: {}]  }
   0x1   :  { %1192 = sst [smem:[#allocation11_spill]] %s1187_s0 }
   0x2   :  { %9 = vsyncpa [#allocation3], 0 }
   0x3   :  { %11 = vsyncpa [#allocation3 + $0x1], 0 }
   0x4   :  { %12 = vsyncpa [#allocation6], 0 }
   0x5   :  { %14 = vsyncpa [#allocation6 + $0x1], 0 }
   0x6   :  { %15 = vsyncpa [#allocation4], 0 }
   0x7   :  { %17 = vsyncpa [#allocation4 + $0x1], 0  ;;  %s943_s15 = smov 0   ;;  %s945_s16 = smov 0  }
   0x8   :  { %s947_s17 = smov 0   ;;  %s949_s18 = smov 0  }
   0x9 LB: > { %s964_s19 = sadd.s32 4294967295, %s892_s18   ;;  %s653_s20 = sadd.s32 4294967294, %s892_s18   ;;  %s892_s18 = sphi %s949_s18, %s1204_s18   ;;  %s888_s17 = sphi %s947_s17, %s1203_s17   ;;  %s884_s16 = sphi %s945_s16, %s1202_s16   ;;  %s880_s15 = sphi %s943_s15, %s1201_s15  }
   0xa   : > { %s968_s21 = sadd.s32 1, %s892_s18   ;;  %s30_s22 = sadd.s32 1, %s888_s17 }
   0xb   : > { %s27_s23 = ssub.s32 %s892_s18, %s968_s21  ;;  %p37_p0 = scmp.ne.s32.totalorder %s888_s17, %s884_s16 }
   0xc   : > { %p28_p1 = scmp.eq.s32.totalorder %s27_s23, 0  ;;  %p38_p2 = scmp.eq.s32.totalorder %s892_s18, 0 }
   0xd   : > { %p43_p3 = scmp.ne.s32.totalorder %s884_s16, %s880_s15  ;;  %p44_p4 = scmp.eq.s32.totalorder %s964_s19, 0 }
   0xe   : > { %s980_s24 = scalar_select %p28_p1, %s888_s17, %s30_s22  }
   0xf   : > { %p982_p5 = por %p38_p2, %p37_p0  ;;  %p986_p6 = por %p44_p4, %p43_p3 }
  0x10   : > { %p135_p7 = scmp.eq.s32.totalorder %s964_s19, 1  ;;  %p141_p8 = scmp.eq.s32.totalorder %s653_s20, 1 }
  0x11   : > { %p701_p10 = scmp.lt.s32.totalorder %s892_s18, 2  ;;  %s1002_s29 = sand.u32 1, %s888_s17  }
  0x12   : > { %p993_p11 = por %p135_p7, %p37_p0  ;;  %p997_p12 = por %p141_p8, %p43_p3 }
  0x13   : > { %s657_s30 = sshll.u32 %s892_s18, 2  ;;  %s656_s5 = sshll.u32 %s1002_s29, 2 }
  0x14   : > { %s1197_s0 = sld [smem:[#allocation11_spill]]  ;;  %s171_s10 = scalar_lea.vmem [#allocation2], %s656_s5 }
  0x15   : > { %s179_s11 = sshll.u32 %s171_s10, 4  ;;  %p1011_p13 = pnand %p701_p10, %p982_p5  ;;  %s180_s11 = int_to_ptr.vmem [resolvable:$true] %s179_s11 }
  0x16   : > { %p660_p0 = scmp.ge.s32.totalorder %s892_s18, 1  ;;  %p203_p1 = scmp.lt.s32.totalorder %s892_s18, 3 }
  0x17   : > { %s658_s13 = sshll.u32 %s1002_s29, 3  ;;  %s168_s14 = scalar_lea.sflag [#allocation3], %s1002_s29 }
  0x18   : > { %p766_p3 = pneg %p1011_p13 }
  0x1a   : > { %s175_s8 = scalar_lea.hbm %s1197_s0, %s657_s30  ;;  %s769_s30 = scalar_lea.hbm %s1197_s0, 8 }
  0x1b   : > { %s177_s9 = sshll.u32 %s175_s8, 4  ;;  %s178_s9 = int_to_ptr.hbm [resolvable:$true] %s177_s9 }
  0x1c   : > { %s762_s20 = sshra.s32 %s178_s9, 4  ;;  %s763_s20 = int_to_ptr.hbm [resolvable:$true] %s762_s20 }
  0x1d   : > { %s764_s22 = scalar_lea.hbm %s763_s20, 4  ;;  %p770_p5 = scmp.lt.s32.totalorder %s763_s20, %s1197_s0 }
  0x1e   : > { %p765_p2 = scmp.ne.s32.totalorder %s763_s20, %s764_s22  ;;  %p771_p8 = scmp.lt.s32.totalorder %s769_s30, %s764_s22 }
  0x20   : > { %p767_p4 = pnand %p766_p3, %p765_p2  ;;  %p772_p10 = por %p771_p8, %p770_p5 }
  0x22   : > { %p768_p7 = pneg %p767_p4 }
  0x24   : > { %p773_p9 = pnand %p772_p10, %p768_p7 }
  0x26   : > { %776 = shalt.err (!%p773_p9)
}
  0x27   : > { %693 = dma.hbm_to_vmem [thread:$0]  (!%p1011_p13), %s178_s9, 64, %s180_s11, %s168_s14  }
  0x28   : > { %p1036_p2 = pnand %p660_p0, %p203_p1  ;;  %s659_s8 = sshll.u32 %s892_s18, 3 }
  0x29   : > { %s190_s10 = scalar_lea.vmem [#allocation5], %s658_s13  ;;  %s194_s25 = scalar_lea.hbm %s1188_s1, %s659_s8 }
  0x2a   : > { %s198_s20 = sshll.u32 %s190_s10, 4  ;;  %s196_s30 = sshll.u32 %s194_s25, 4  ;;  %s199_s20 = int_to_ptr.vmem [resolvable:$true] %s198_s20  ;;  %s197_s30 = int_to_ptr.hbm [resolvable:$true] %s196_s30 }
  0x2b   : > { %s187_s5 = scalar_lea.sflag [#allocation6], %s1002_s29  ;;  %s792_s6 = sshra.s32 %s197_s30, 4  ;;  %s793_s6 = int_to_ptr.hbm [resolvable:$true] %s792_s6 }
  0x2c   : > { %s794_s9 = scalar_lea.hbm %s793_s6, 8  ;;  %s799_s13 = scalar_lea.hbm %s1188_s1, 16 }
  0x2d   : > { %p795_p9 = scmp.ne.s32.totalorder %s793_s6, %s794_s9  ;;  %p800_p4 = scmp.lt.s32.totalorder %s793_s6, %s1188_s1 }
  0x2e   : > { %p801_p7 = scmp.lt.s32.totalorder %s799_s13, %s794_s9 }
  0x2f   : > { %p797_p0 = pnand %p795_p9, %p766_p3 }
  0x30   : > { %p802_p5 = por %p801_p7, %p800_p4 }
  0x31   : > { %p798_p1 = pneg %p797_p0 }
  0x33   : > { %p803_p8 = pnand %p802_p5, %p798_p1 }
  0x35   : > { %806 = shalt.err (!%p803_p8)
}
  0x36   : > { %696 = dma.hbm_to_vmem [thread:$0]  (!%p1011_p13), %s197_s30, 128, %s199_s20, %s187_s5  }
  0x37   : > { %207 = sbr.rel (%p1036_p2) target bundleno = 615 (0x267), region = 36  ;;  %s1059_s29 = sand.u32 (!%p1036_p2), 1, %s884_s16  }
  0x38   : > { %s661_s8 = sshll.u32 (!%p1036_p2), %s1059_s29, 2  ;;  %s210_s22 = scalar_lea.sflag (!%p1036_p2), [#allocation3], %s1059_s29 }
  0x39   : > { %s213_s0 = scalar_lea.vmem (!%p1036_p2), [#allocation2], %s661_s8 }
  0x3c   : > { %867 = dma.done.wait (%p986_p6), %s210_s22, 64  }
  0x3d   : > { %869 = vsyncadd (%p986_p6), %s210_s22, 4294967232  ;;  %s662_s12 = sshll.u32 %s1059_s29, 3  ;;  %s220_s7 = scalar_lea.sflag [#allocation6], %s1059_s29 }
  0x3e   : > { %s1069_s20 = scalar_lea.vmem [#allocation5], %s662_s12 }
  0x3f   : > { %871 = dma.done.wait (%p986_p6), %s220_s7, 128  }
  0x40   : > { %873 = vsyncadd (%p986_p6), %s220_s7, 4294967168  ;;  %v1075_v0 = vld [vmem:[%s213_s0] sm:$0xf]  ;;  %s894_s23 = smov 123   ;;  %s895_s25 = smov 122   ;;  %vm316_vm0 = vcmask 31744  }
  0x41   : > { %302 = vrot.lane.b32.xlu1 %v1075_v0, %s894_s23  ;;  %294 = vrot.lane.b32.xlu0 %v1075_v0, %s895_s25  ;;  %s896_s30 = smov 124   ;;  %s897_s5 = smov 3   ;;  %vm308_vm1 = vcmask 23552   ;;  %vm300_vm2 = vcmask 15360   ;;  %vm324_vm3 = vcmask 39936   ;;  %vm340_vm4 = vcmask 56320  }
  0x42   : > { %310 = vrot.lane.b32.xlu2 %v1075_v0, %s896_s30  ;;  %s898_s6 = smov 2   ;;  %s899_s9 = smov 4   ;;  %vm332_vm5 = vcmask 48128   ;;  %v372_v17 = vld [vmem:[%s1189_s2] sm:$0xff]  ;;  %vm292_vm6 = vcmask 7168   ;;  %v373_v20 = vld [vmem:[%s1189_s2 + $0x8] sm:$0xff] }
  0x43   : > { %s900_s26 = smov 5   ;;  %s901_s11 = smov 125   ;;  %vm274_vm7 = vcmask 64512   ;;  %vm276_vm8 = vcmask 130048   ;;  %vm278_vm9 = vcmask 195584   ;;  %vm280_vm10 = vcmask 261120  }
  0x44   : > { %s902_s14 = smov 126   ;;  %s903_s13 = smov 127   ;;  %vm282_vm11 = vcmask 326656   ;;  %vm284_vm12 = vcmask 392192   ;;  %vm384_vm13 = vcmask 1043456   ;;  %v445_v36 = vld [vmem:[%s1069_s20] sm:$0xff] }
  0x45   : > { %s904_s10 = smov 6   ;;  %s905_s8 = smov 7   ;;  %465 = vmatpush.msra.mxu2 %v445_v36  ;;  %v475_v37 = vld [vmem:[%s1190_s3] sm:$0xff]  ;;  %v476_v38 = vld [vmem:[%s1190_s3 + $0x8] sm:$0xff]  ;;  %v916_v39 = vmov 0   ;;  %v675_v42 = vld [vmem:[%s1190_s3 + $0x18] sm:$0xff] }
  0x46   : > { %s906_s22 = smov 1   ;;  %s907_s0 = smov 121   ;;  %670 = vmatmul.msk.f32.vlgmr.msra.gmra.mxu2 %vm274_vm7, %v372_v17  ;;  %760 = vset.pattern.permute.xlu1 %v916_v39  ;;  %v674_v57 = vld [vmem:[%s1190_s3 + $0x10] sm:$0xff]  ;;  %vm538_vm14 = vcmask 457728  }
  0x47   : > { %s908_s12 = smov 8   ;;  %s909_s7 = smov 16   ;;  %759 = vset.pattern.permute.xlu0 %v916_v39  ;;  %761 = vset.pattern.permute.xlu2 %v916_v39 }
  0x48   : > { %s910_s23 = smov 24   ;;  %s911_s25 = smov 32  }
  0x49   : > { %305 = vrot.lane.b32.xlu1 %v1075_v0, %s897_s5  ;;  %297 = vrot.lane.b32.xlu0 %v1075_v0, %s898_s6  ;;  %s912_s30 = smov 40   ;;  %s913_s5 = smov 48  }
  0x4a   : > { %313 = vrot.lane.b32.xlu2 %v1075_v0, %s899_s9  ;;  %s542_s20 = scalar_lea.sflag [#allocation4], %s1059_s29 }
  0x4e   : > { %671 = vmatmul.msk.f32.gmra.mxu2 %vm274_vm7, %v373_v20 }
  0x51   : > { %321 = vrot.lane.b32.xlu1 %v1075_v0, %s900_s26  ;;  %318 = vrot.lane.b32.xlu0 %v1075_v0, %s901_s11  ;;  %s914_s26 = smov 120   ;;  %s683_s11 = sshll.u32 %s964_s19, 4 }
  0x52   : > { %326 = vrot.lane.b32.xlu2 %v1075_v0, %s902_s14 }
  0x59   : > { %334 = vrot.lane.b32.xlu1 %v1075_v0, %s903_s13  ;;  %329 = vrot.lane.b32.xlu0 %v1075_v0, %s904_s10  ;;  %s915_s13 = smov 116  }
  0x5a   : > { %337 = vrot.lane.b32.xlu2 %v1075_v0, %s905_s8  ;;  %s553_s8 = scalar_lea.hbm %s1191_s4, %s683_s11 }
  0x61   : > { %289 = vrot.lane.b32.xlu1 %v1075_v0, %s906_s22  ;;  %286 = vrot.lane.b32.xlu0 %v1075_v0, %s907_s0  ;;  %s556_s0 = sshll.u32 %s553_s8, 4  ;;  %s557_s0 = int_to_ptr.hbm [resolvable:$true] %s556_s0 }
  0x62   : > { %256 = vrot.lane.b32.xlu2 %v1075_v0, %s908_s12 }
  0x69   : > { %259 = vrot.lane.b32.xlu1 %v1075_v0, %s909_s7  ;;  %262 = vrot.lane.b32.xlu0 %v1075_v0, %s910_s23 }
  0x6a   : > { %265 = vrot.lane.b32.xlu2 %v1075_v0, %s911_s25 }
  0x71   : > { %268 = vrot.lane.b32.xlu1 %v1075_v0, %s912_s30  ;;  %271 = vrot.lane.b32.xlu0 %v1075_v0, %s913_s5 }
  0x9c   : > { %v311_v1 = vpop.permute.xlu2 %310 }
  0xa4   : > { %v314_v2 = vpop.permute.xlu2 %313 }
  0xa5   : > { %v317_v3 = vsel %vm316_vm0, %v311_v1, %v314_v2 }
  0xa6   : > { %351 = vrot.lane.b32.xlu1 %v317_v3, %s910_s23 }
  0xac   : > { %v327_v10 = vpop.permute.xlu2 %326 }
  0xb3   : > { %v303_v4 = vpop.permute.xlu1 %302  ;;  %v295_v5 = vpop.permute.xlu0 %294 }
  0xb4   : > { %v338_v14 = vpop.permute.xlu2 %337 }
  0xbb   : > { %v306_v6 = vpop.permute.xlu1 %305  ;;  %v298_v7 = vpop.permute.xlu0 %297 }
  0xbc   : > { %v309_v8 = vsel %vm308_vm1, %v303_v4, %v306_v6  ;;  %v301_v9 = vsel %vm300_vm2, %v295_v5, %v298_v7  ;;  %v257_v24 = vpop.permute.xlu2 %256 }
  0xbd   : > { %347 = vrot.lane.b32.xlu2 %v309_v8, %s909_s7  ;;  %343 = vrot.lane.b32.xlu0 %v301_v9, %s908_s12  ;;  %v275_v25 = vsel %vm274_vm7, %v1075_v0, %v257_v24  ;;  %s836_s7 = sshra.s32 %s557_s0, 4  ;;  %s837_s7 = int_to_ptr.hbm [resolvable:$true] %s836_s7 }
  0xbe   : > { %s838_s19 = scalar_lea.hbm %s837_s7, 16  ;;  %p843_p10 = scmp.lt.s32.totalorder %s837_s7, %s1191_s4 }
  0xbf   : > { %p839_p6 = scmp.ne.s32.totalorder %s837_s7, %s838_s19 }
  0xc1   : > { %p840_p13 = pnand %p839_p6, %p993_p11 }
  0xc3   : > { %v322_v11 = vpop.permute.xlu1 %321  ;;  %v319_v12 = vpop.permute.xlu0 %318  ;;  %p841_p3 = pneg %p840_p13 }
  0xc4   : > { %v325_v13 = vsel %vm324_vm3, %v319_v12, %v322_v11  ;;  %v266_v30 = vpop.permute.xlu2 %265  ;;  %v673_v11 = vld [vmem:[%s1189_s2 + $0x18] sm:$0xff] }
  0xc5   : > { %355 = vrot.lane.b32.xlu0 %v325_v13, %s911_s25 }
  0xc9   : > { %v467_v58 = vpop.f32.mrf.mxu2 }
  0xcb   : > { %v335_v15 = vpop.permute.xlu1 %334  ;;  %v330_v16 = vpop.permute.xlu0 %329 }
  0xcc   : > { %v341_v18 = vsel %vm340_vm4, %v335_v15, %v338_v14  ;;  %v333_v19 = vsel %vm332_vm5, %v327_v10, %v330_v16  ;;  %v672_v10 = vld [vmem:[%s1189_s2 + $0x10] sm:$0xff] }
  0xcd   : > { %363 = vrot.lane.b32.xlu1 %v341_v18, %s913_s5  ;;  %359 = vrot.lane.b32.xlu2 %v333_v19, %s912_s30  ;;  %s842_s30 = scalar_lea.hbm %s1191_s4, 32 }
  0xce   : > { %411 = vrot.lane.b32.xlu0 %v372_v17, %s914_s26  ;;  %p844_p2 = scmp.lt.s32.totalorder %s842_s30, %s838_s19 }
  0xd0   : > { %p845_p9 = por %p844_p2, %p843_p10 }
  0xd1   : > { %v470_v0 = vpop.f32.mrf.mxu2 }
  0xd2   : > { %p846_p0 = pnand %p845_p9, %p841_p3 }
  0xd3   : > { %v290_v21 = vpop.permute.xlu1 %289  ;;  %v287_v22 = vpop.permute.xlu0 %286 }
  0xd4   : > { %v293_v23 = vsel %vm292_vm6, %v287_v22, %v290_v21 }
  0xd5   : > { %378 = vrot.lane.b32.xlu1 %v373_v20, %s915_s13  ;;  %376 = vrot.lane.b32.xlu2 %v372_v17, %s915_s13 }
  0xd6   : > { %484 = vperm.xlu0 %759, %v476_v38  }
  0xdb   : > { %v260_v26 = vpop.permute.xlu1 %259  ;;  %v263_v27 = vpop.permute.xlu0 %262 }
  0xdc   : > { %v277_v28 = vsel %vm276_vm8, %v275_v25, %v260_v26 }
  0xdd   : > { %413 = vrot.lane.b32.xlu2 %v373_v20, %s914_s26  ;;  %v279_v29 = vsel %vm278_vm9, %v277_v28, %v263_v27  ;;  %479 = vperm.xlu1 %760, %v475_v37   ;;  %s663_s26 = sshll.u32 %s1059_s29, 4 }
  0xde   : > { %v281_v31 = vsel %vm280_vm10, %v279_v29, %v266_v30  ;;  %s253_s14 = scalar_lea.vmem [#allocation7], %s663_s26 }
  0xdf   : > { %s554_s22 = sshll.u32 %s253_s14, 4  ;;  %s555_s22 = int_to_ptr.vmem [resolvable:$true] %s554_s22 }
  0xe3   : > { %v269_v32 = vpop.permute.xlu1 %268  ;;  %v272_v33 = vpop.permute.xlu0 %271 }
  0xe4   : > { %v283_v34 = vsel %vm282_vm11, %v281_v31, %v269_v32 }
  0xe5   : > { %v285_v35 = vsel %vm284_vm12, %v283_v34, %v272_v33  ;;  %504 = vperm.xlu1 %760, %v675_v42   ;;  %499 = vperm.xlu2 %761, %v674_v57  }
  0xe6   : > { %667 = vmatpush.msk.msra.mxu1 %vm384_vm13, %v285_v35 }
 0x117   : > { %v348_v40 = vpop.permute.xlu2 %347 }
 0x118   : > { %v352_v45 = vpop.permute.xlu1 %351 }
 0x127   : > { %v360_v43 = vpop.permute.xlu2 %359 }
 0x12f   : > { %v344_v41 = vpop.permute.xlu0 %343  ;;  %v377_v50 = vpop.permute.xlu2 %376 }
 0x130   : > { %v366_v44 = vsel %vm274_vm7, %v293_v23, %v344_v41 }
 0x131   : > { %v367_v46 = vsel %vm276_vm8, %v366_v44, %v348_v40 }
 0x132   : > { %v368_v48 = vsel %vm278_vm9, %v367_v46, %v352_v45 }
 0x137   : > { %v356_v47 = vpop.permute.xlu0 %355  ;;  %v414_v55 = vpop.permute.xlu2 %413 }
 0x138   : > { %v369_v49 = vsel %vm280_vm10, %v368_v48, %v356_v47 }
 0x139   : > { %v370_v52 = vsel %vm282_vm11, %v369_v49, %v360_v43 }
 0x13f   : > { %v364_v51 = vpop.permute.xlu1 %363  ;;  %v500_v12 = vpop.permute.xlu2 %499 }
 0x140   : > { %v371_v53 = vsel %vm284_vm12, %v370_v52, %v364_v51  ;;  %v412_v54 = vpop.permute.xlu0 %411 }
 0x141   : > { %664 = vmatpush.msk.msra.mxu0 %vm384_vm13, %v371_v53  ;;  %668 = vmatmul.msk.f32.vlgmr.msra.gmra.mxu1 %vm316_vm0, %v412_v54 }
 0x142   : > { %665 = vmatmul.msk.f32.vlgmr.msra.gmra.mxu0 %vm316_vm0, %v377_v50 }
 0x147   : > { %v379_v56 = vpop.permute.xlu1 %378 }
 0x148   : > { %v485_v4 = vpop.permute.xlu0 %484 }
 0x149   : > { %669 = vmatmul.msk.f32.gmra.mxu1 %vm316_vm0, %v414_v55 }
 0x14a   : > { %666 = vmatmul.msk.f32.gmra.mxu0 %vm316_vm0, %v379_v56 }
 0x14f   : > { %v480_v3 = vpop.permute.xlu1 %479 }
 0x157   : > { %v505_v16 = vpop.permute.xlu1 %504 }
 0x1be   : > { %v439_v59 = vpop.f32.mrf.mxu1 }
 0x1bf   : > { %v405_v60 = vpop.f32.mrf.mxu0 }
 0x1c0   : > { %v440_v61 = vadd.f32 %v439_v59, %v405_v60 }
 0x1c2   : > { %v473_v1 = vadd.f32 %v467_v58, %v440_v61 }
 0x1c4   : > { %v487_v6 = vadd.f32 %v480_v3, %v473_v1 }
 0x1c6   : > { %v442_v62 = vpop.f32.mrf.mxu1  ;;  %v489_v9 = vmax.f32 %v487_v6, 0.0 }
 0x1c7   : > { %v408_v63 = vpop.f32.mrf.mxu0 }
 0x1c8   : > { %v443_v2 = vadd.f32 %v442_v62, %v408_v63 }
 0x1ca   : > { %v474_v5 = vadd.f32 %v470_v0, %v443_v2 }
 0x1cc   : > { %v488_v7 = vadd.f32 %v485_v4, %v474_v5 }
 0x1ce   : > { %v490_v8 = vmax.f32 %v488_v7, 0.0 }
 0x1d0   : > { %527 = vmatpush.msra.mxu3 %v490_v8 }
 0x1d2   : > { %528 = vmatpush.msra.mxu3 %v489_v9 }
 0x1d3   : > { %676 = vmatmul.msk.f32.vlgmr.msra.gmra.mxu3 %vm276_vm8, %v672_v10 }
 0x1db   : > { %677 = vmatmul.msk.f32.gmra.mxu3 %vm276_vm8, %v673_v11 }
 0x256   : > { %v530_v13 = vpop.f32.mrf.mxu3 }
 0x257   : > { %v531_v14 = vadd.f32 %v530_v13, %v500_v12 }
 0x259   : > { %v536_v15 = vmax.f32 %v531_v14, 0.0 }
 0x25b   : > { %539 = vst.msk [vmem:[%s253_s14] sm:$0xff] %vm538_vm14, %v536_v15 }
 0x25e   : > { %v533_v17 = vpop.f32.mrf.mxu3 }
 0x25f   : > { %v534_v18 = vadd.f32 %v533_v17, %v505_v16 }
 0x261   : > { %v537_v19 = vmax.f32 %v534_v18, 0.0 }
 0x263   : > { %540 = vst.msk [vmem:[%s253_s14 + $0x8] sm:$0xff] %vm538_vm14, %v537_v19 }
 0x264   : > { %849 = shalt.err (!%p846_p0)
}
 0x265   : > { %s917_s29 = smov 128  }
 0x266   : > { %688 = dma.vmem_to_hbm [thread:$0]  (%p993_p11), %s555_s22, 256, %s557_s0, %s542_s20, %s917_s29, %s917_s29, %s908_s12  }
 0x267 PF: > { %s571_s9 = sand.u32 1, %s880_s15   ;;  %p1200_p1 = scmp.ge.s32.totalorder %s892_s18, 2 }
 0x268   : > { %s572_s26 = scalar_lea.sflag [#allocation4], %s571_s9 }
 0x269   : > { %p698_p4 = pnand %p1200_p1, %p997_p12 }
 0x26b   : > { %p699_p7 = pneg %p698_p4 }
 0x26d   : > { %875 = dma.done.wait (%p699_p7), %s572_s26, 256  }
 0x26e   : > { %877 = vsyncadd (%p699_p7), %s572_s26, 4294967040  ;;  %p20_p5 = scmp.ge.s32.totalorder %s968_s21, 4   ;;  %s1201_s15 = smov %s884_s16 }
 0x26f   : > { %s1202_s16 = smov %s888_s17  ;;  %s1203_s17 = smov %s980_s24 }
 0x270   : > { %s1204_s18 = smov %s968_s21  ;;  %22 = sbr.rel (!%p20_p5) target bundleno = 9 (0x9), region = 96 }
 0x275   :  { %578 = vsyncpa [#allocation3], 1 }
 0x276   :  { %580 = vsyncpa [#allocation3 + $0x1], 1 }
 0x277   :  { %581 = vsyncpa [#allocation6], 1 }
 0x278   :  { %583 = vsyncpa [#allocation6 + $0x1], 1 }
 0x279   :  { %584 = vsyncpa [#allocation4], 1 }
 0x27a   :  { %586 = vsyncpa [#allocation4 + $0x1], 1 }

</bundles_post_ra>
